<compile_context>
chip_gen: v5e
topology: v5e:2x2
jax: 0.10.0
libtpu: 0.0.40
codegen_flags: <defaults>
</compile_context>

<pallas_src>
import jax
import jax.numpy as jnp
from jax.experimental import pallas as pl
from jax.experimental.pallas import tpu as pltpu


def _round_up(v: int, m: int) -> int:
    return ((v + m - 1) // m) * m


def _td_matmul_bias_kernel(x_ref, w_ref, b_ref, o_ref):
    # Whole K fits in one block: fused matmul + bias, no scratch accumulator.
    acc = jnp.dot(x_ref[...], w_ref[...], preferred_element_type=jnp.float32)
    o_ref[...] = (acc + b_ref[...].astype(jnp.float32)).astype(o_ref.dtype)


def _td_matmul_acc_kernel(x_ref, w_ref, b_ref, o_ref, acc_ref):
    # Grid = (M_tiles, N_tiles, K_tiles); K (reduction) is the last axis.
    k = pl.program_id(2)

    @pl.when(k == 0)
    def _():
        acc_ref[...] = jnp.zeros_like(acc_ref)

    acc_ref[...] += jnp.dot(
        x_ref[...], w_ref[...], preferred_element_type=jnp.float32
    )

    @pl.when(k == pl.num_programs(2) - 1)
    def _():
        o_ref[...] = (acc_ref[...] + b_ref[...].astype(jnp.float32)).astype(o_ref.dtype)


def time_distributed_linear(
    x,
    weight,
    bias,
    *,
    tile_m: int = 256,
    tile_n: int = 512,
    tile_k: int = 512,
    compute_dtype=None,
):
    """
    x:      (batch, seq, ..., hidden)
    weight: (out_dim, hidden)   -- PyTorch nn.Linear layout
    bias:   (out_dim,)
    returns TimeDistributed-shaped output: (batch, seq, c_out, out_dim)
            (c_out = 1 when x is 3-D, = x.shape[2] when x is 4-D, ...)
    compute_dtype: optional MXU input dtype (e.g. jnp.bfloat16 on v6e/v7x);
                   accumulation is always f32, output keeps x.dtype.
    """
    assert x.ndim >= 3, "TimeDistributed input must have at least 3 dims"
    batch, seq = x.shape[:2]
    hidden = x.shape[-1]
    out_dim = weight.shape[0]
    assert weight.shape[1] == hidden and bias.shape == (out_dim,)

    rows = 1
    for d in x.shape[:-1]:
        rows *= int(d)

    out_dtype = x.dtype
    cdt = jnp.dtype(compute_dtype) if compute_dtype is not None else jnp.dtype(x.dtype)
    itemsize = cdt.itemsize
    sublane = 8 * (4 // itemsize)  # 8 for f32, 16 for bf16

    # Glue: flatten, transpose weight so the kernel is a plain row-tiled matmul.
    x_flat = x.reshape(rows, hidden).astype(cdt)
    w_t = weight.T.astype(cdt)                       # (hidden, out_dim)
    b_row = bias.reshape(1, out_dim).astype(jnp.float32)

    # Tile selection: lane-dense (multiples of 128) on K/N, sublane-aligned on M,
    # clamped so tiny problems don't get oversized blocks.
    tile_n = min(tile_n, _round_up(out_dim, 128))
    tile_k = min(tile_k, _round_up(hidden, 128))
    tile_m = _round_up(min(tile_m, _round_up(rows, sublane)), sublane)

    rows_p = _round_up(rows, tile_m)
    k_p = _round_up(hidden, tile_k)
    n_p = _round_up(out_dim, tile_n)

    # Zero-padding: padded K contributes 0 to the dot; padded rows/cols are
    # sliced off afterwards.  Only pad when needed (avoids extra HBM copies).
    x_p = x_flat
    if rows_p != rows or k_p != hidden:
        x_p = jnp.pad(x_flat, ((0, rows_p - rows), (0, k_p - hidden)))
    w_p = w_t
    if k_p != hidden or n_p != out_dim:
        w_p = jnp.pad(w_t, ((0, k_p - hidden), (0, n_p - out_dim)))
    b_p = b_row
    if n_p != out_dim:
        b_p = jnp.pad(b_row, ((0, 0), (0, n_p - out_dim)))

    m_tiles = rows_p // tile_m
    n_tiles = n_p // tile_n
    k_tiles = k_p // tile_k

    # VMEM budget: double-buffered inputs/outputs + f32 accumulator, headroom,
    # capped well under v7x's 64 MiB physical VMEM.
    block_bytes = (
        2 * (tile_m * tile_k + tile_k * tile_n) * itemsize
        + 2 * tile_m * tile_n * jnp.dtype(out_dtype).itemsize
        + tile_m * tile_n * 4          # accumulator
        + 2 * tile_n * 4               # bias row
    )
    vmem_limit = int(min(max(2 * block_bytes, 32 << 20), 56 << 20))

    if k_tiles == 1:
        # Single-K-tile path: no scratch, all-parallel 2-D grid.
        y_p = pl.pallas_call(
            _td_matmul_bias_kernel,
            out_shape=jax.ShapeDtypeStruct((rows_p, n_p), out_dtype),
            grid_spec=pltpu.PrefetchScalarGridSpec(
                num_scalar_prefetch=0,
                grid=(m_tiles, n_tiles),
                in_specs=[
                    pl.BlockSpec((tile_m, tile_k), lambda i, j: (i, 0)),
                    pl.BlockSpec((tile_k, tile_n), lambda i, j: (0, j)),
                    pl.BlockSpec((1, tile_n), lambda i, j: (0, j)),
                ],
                out_specs=pl.BlockSpec((tile_m, tile_n), lambda i, j: (i, j)),
            ),
            compiler_params=pltpu.CompilerParams(
                dimension_semantics=("parallel", "parallel"),
                vmem_limit_bytes=vmem_limit,
            ),
        )(x_p, w_p, b_p)
    else:
        # K-reduction path: f32 accumulator resident across the K axis.
        y_p = pl.pallas_call(
            _td_matmul_acc_kernel,
            out_shape=jax.ShapeDtypeStruct((rows_p, n_p), out_dtype),
            grid_spec=pltpu.PrefetchScalarGridSpec(
                num_scalar_prefetch=0,
                grid=(m_tiles, n_tiles, k_tiles),
                in_specs=[
                    pl.BlockSpec((tile_m, tile_k), lambda i, j, k: (i, k)),
                    pl.BlockSpec((tile_k, tile_n), lambda i, j, k: (k, j)),
                    pl.BlockSpec((1, tile_n), lambda i, j, k: (0, j)),
                ],
                out_specs=pl.BlockSpec((tile_m, tile_n), lambda i, j, k: (i, j)),
                scratch_shapes=[pltpu.VMEM((tile_m, tile_n), jnp.float32)],
            ),
            compiler_params=pltpu.CompilerParams(
                dimension_semantics=("parallel", "parallel", "arbitrary"),
                vmem_limit_bytes=vmem_limit,
            ),
        )(x_p, w_p, b_p)

    y = y_p[:rows, :out_dim]
    # TimeDistributed reshape rule (matches torch .view for all ranks torch accepts).
    return y.reshape(batch, seq, -1, out_dim)


if __name__ == "__main__":
    key = jax.random.PRNGKey(0)
    k_x, k_w, k_b, k_x4 = jax.random.split(key, 4)

    batch, seq, hidden, out_dim = 2, 8, 32, 32

    x = jax.random.normal(k_x, (batch, seq, hidden), dtype=jnp.float32)
    # Deterministic synthetic parameters (nn.Linear(hidden, out_dim) shapes).
    weight = jax.random.normal(k_w, (out_dim, hidden), dtype=jnp.float32) * 0.05
    bias = jax.random.normal(k_b, (out_dim,), dtype=jnp.float32) * 0.05

    # f32 path (3-D input -> (batch, seq, 1, out_dim)).
    y = jax.block_until_ready(time_distributed_linear(x, weight, bias))
    ref = (x.reshape(batch * seq, hidden) @ weight.T + bias).reshape(
        batch, seq, 1, out_dim
    )
    assert y.shape == (batch, seq, 1, out_dim)
    assert jnp.allclose(y, ref, atol=1e-5, rtol=1e-5)

    # bf16 compute path (recommended on v6e/v7x); accumulation stays f32.
    y_bf16 = jax.block_until_ready(
        time_distributed_linear(x, weight, bias, compute_dtype=jnp.bfloat16)
    )
    assert y_bf16.shape == (batch, seq, 1, out_dim)
    assert jnp.allclose(y_bf16.astype(jnp.float32), ref, atol=5e-2, rtol=5e-2)

    # 4-D input path (-> (batch, seq, c, out_dim)), exercises the same kernel.
    c = 4
    x4 = jax.random.normal(k_x4, (batch, seq, c, hidden), dtype=jnp.float32)
    y4 = jax.block_until_ready(time_distributed_linear(x4, weight, bias))
    ref4 = (x4.reshape(batch * seq * c, hidden) @ weight.T + bias).reshape(
        batch, seq, c, out_dim
    )
    assert y4.shape == (batch, seq, c, out_dim)
    assert jnp.allclose(y4, ref4, atol=1e-5, rtol=1e-5)

    print("KERNEL_OK")
</pallas_src>

<mosaic_0001>
module attributes {stable_mosaic.version = 11 : i64} {
  func.func @_td_matmul_bias_kernel(%arg0: i32, %arg1: i32, %arg2: memref<16x128xf32, #tpu.memory_space<vmem>>, %arg3: memref<128x128xf32, #tpu.memory_space<vmem>>, %arg4: memref<1x128xf32, #tpu.memory_space<vmem>>, %arg5: memref<16x128xf32, #tpu.memory_space<vmem>>) attributes {dimension_semantics = [#tpu.dimension_semantics<parallel>, #tpu.dimension_semantics<parallel>], iteration_bounds = array<i64: 1, 1>, scalar_prefetch = 0 : i64, scratch_operands = 0 : i64, tpu.core_type = #tpu.core_type<tc>, window_params = [{transform_indices = @transform_0, window_bounds = array<i64: 16, 128>}, {transform_indices = @transform_1, window_bounds = array<i64: 128, 128>}, {transform_indices = @transform_2, window_bounds = array<i64: 1, 128>}, {transform_indices = @transform_3, window_bounds = array<i64: 16, 128>}]} {
    %c0 = arith.constant 0 : index
    %c0_0 = arith.constant 0 : index
    %0 = vector.load %arg2[%c0, %c0_0] : memref<16x128xf32, #tpu.memory_space<vmem>>, vector<16x128xf32>
    %c0_1 = arith.constant 0 : index
    %c0_2 = arith.constant 0 : index
    %1 = vector.load %arg3[%c0_1, %c0_2] : memref<128x128xf32, #tpu.memory_space<vmem>>, vector<128x128xf32>
    %cst = arith.constant dense<0.000000e+00> : vector<16x128xf32>
    %2 = tpu.matmul %0, %1, %cst {dimension_numbers = #tpu.dot_dimension_numbers<[1], [0], [0], [1], [0, 0, 1, 1], [], []>} : vector<16x128xf32>, vector<128x128xf32>, vector<16x128xf32> -> vector<16x128xf32>
    %c0_3 = arith.constant 0 : index
    %c0_4 = arith.constant 0 : index
    %3 = vector.load %arg4[%c0_3, %c0_4] : memref<1x128xf32, #tpu.memory_space<vmem>>, vector<1x128xf32>
    %4 = vector.broadcast %3 : vector<1x128xf32> to vector<16x128xf32>
    %5 = arith.addf %2, %4 : vector<16x128xf32>
    %c0_5 = arith.constant 0 : index
    %c0_6 = arith.constant 0 : index
    %6 = vector.load %arg5[%c0_5, %c0_6] : memref<16x128xf32, #tpu.memory_space<vmem>>, vector<16x128xf32>
    tpu.vector_store %arg5[%c0_5, %c0_6], %5 {strides = array<i32>} : memref<16x128xf32, #tpu.memory_space<vmem>>, vector<16x128xf32>,
    return
  }
  func.func @transform_0(%arg0: i32, %arg1: i32) -> (i32, i32) {
    %c0_i32 = arith.constant 0 : i32
    %c0_i32_0 = arith.constant 0 : i32
    return %arg0, %c0_i32 : i32, i32
  }
  func.func @transform_1(%arg0: i32, %arg1: i32) -> (i32, i32) {
    %c0_i32 = arith.constant 0 : i32
    %c0_i32_0 = arith.constant 0 : i32
    return %c0_i32, %arg1 : i32, i32
  }
  func.func @transform_2(%arg0: i32, %arg1: i32) -> (i32, i32) {
    %c0_i32 = arith.constant 0 : i32
    %c0_i32_0 = arith.constant 0 : i32
    return %c0_i32, %arg1 : i32, i32
  }
  func.func @transform_3(%arg0: i32, %arg1: i32) -> (i32, i32) {
    %c0_i32 = arith.constant 0 : i32
    return %arg0, %arg1 : i32, i32
  }
}

</mosaic_0001>

<bundles_post_ra>
// kernel: tpu_custom_call.1
= control target key start
LH: loop header
LB: loop body
LE: loop exit
PB: predicated region body
PF: predicated region fallthrough
CT: control target
= control target key end

     0   :  { %8 = vsyncpa [#allocation3], 0  ;;  %s260_s0 = inlined_call_operand.hbm [shape: f32[16,128], index: 0, kind: input, shape index: {}]   ;;  %s261_s1 = inlined_call_operand.hbm [shape: f32[128,128], index: 1, kind: input, shape index: {}]   ;;  %s262_s2 = inlined_call_operand.vmem [shape: f32[1,128], index: 2, kind: input, shape index: {}]   ;;  %s263_s3 = inlined_call_operand.hbm [shape: f32[16,128], index: 3, kind: output, shape index: {}]  }
   0x1   :  { %9 = vsyncpa [#allocation6], 0 }
   0x2   :  { %10 = vsyncpa [#allocation4], 0  ;;  %s15_s14 = sshll.u32 %s260_s0, 4  ;;  %s214_s15 = smov [#allocation2]   ;;  %s16_s14 = int_to_ptr.hbm [resolvable:$true] %s15_s14 }
   0x3   :  { %s17_s16 = sshll.u32 %s214_s15, 4  ;;  %s28_s19 = sshll.u32 %s261_s1, 4  ;;  %s18_s16 = int_to_ptr.vmem [resolvable:$true] %s17_s16  ;;  %s29_s19 = int_to_ptr.hbm [resolvable:$true] %s28_s19 }
   0x4   :  { %s215_s20 = smov 128   ;;  %s216_s21 = smov 8  }
   0x5   :  { %23 = dma.hbm_to_vmem [thread:$0]  %s16_s14, 256, %s18_s16, [#allocation3], %s215_s20, %s215_s20, %s216_s21  }
   0x6   :  { %s217_s22 = smov [#allocation5]  }
   0x7   :  { %s30_s23 = sshll.u32 %s217_s22, 4  ;;  %s31_s23 = int_to_ptr.vmem [resolvable:$true] %s30_s23 }
   0x8   :  { %36 = dma.hbm_to_vmem [thread:$0]  %s29_s19, 2048, %s31_s23, [#allocation6], %s215_s20, %s215_s20, %s216_s21  }
   0x9   :  { %208 = dma.done.wait [#allocation3], 256  }
   0xa   :  { %209 = vsyncadd [#allocation3], 4294967040 }
   0xb   :  { %210 = dma.done.wait [#allocation6], 2048  }
   0xc   :  { %211 = vsyncadd [#allocation6], 4294965248  ;;  %v64_v0 = vld [vmem:[#allocation5 + $0x78] sm:$0xff]  ;;  %v63_v1 = vld [vmem:[#allocation5 + $0x70] sm:$0xff]  ;;  %s218_s24 = smov [#allocation7]   ;;  %s100_s28 = sshll.u32 %s263_s3, 4  ;;  %s101_s28 = int_to_ptr.hbm [resolvable:$true] %s100_s28 }
   0xd   :  { %69 = vmatpush.msra.mxu0 %v64_v0  ;;  %114 = vmatpush.msra.mxu1 %v64_v0  ;;  %v62_v2 = vld [vmem:[#allocation5 + $0x68] sm:$0xff]  ;;  %v61_v3 = vld [vmem:[#allocation5 + $0x60] sm:$0xff]  ;;  %v60_v4 = vld [vmem:[#allocation5 + $0x58] sm:$0xff]  ;;  %s98_s25 = sshll.u32 %s218_s24, 4  ;;  %s99_s25 = int_to_ptr.vmem [resolvable:$true] %s98_s25 }
   0xe   :  { %v59_v5 = vld [vmem:[#allocation5 + $0x50] sm:$0xff]  ;;  %v58_v6 = vld [vmem:[#allocation5 + $0x48] sm:$0xff]  ;;  %v57_v7 = vld [vmem:[#allocation5 + $0x40] sm:$0xff] }
   0xf   :  { %70 = vmatpush.msra.mxu0 %v63_v1  ;;  %115 = vmatpush.msra.mxu1 %v63_v1  ;;  %v56_v8 = vld [vmem:[#allocation5 + $0x38] sm:$0xff]  ;;  %v55_v9 = vld [vmem:[#allocation5 + $0x30] sm:$0xff]  ;;  %v54_v10 = vld [vmem:[#allocation5 + $0x28] sm:$0xff] }
  0x10   :  { %v53_v11 = vld [vmem:[#allocation5 + $0x20] sm:$0xff]  ;;  %v52_v12 = vld [vmem:[#allocation5 + $0x18] sm:$0xff]  ;;  %v51_v13 = vld [vmem:[#allocation5 + $0x10] sm:$0xff] }
  0x11   :  { %71 = vmatpush.msra.mxu0 %v62_v2  ;;  %116 = vmatpush.msra.mxu1 %v62_v2  ;;  %v50_v14 = vld [vmem:[#allocation5 + $0x8] sm:$0xff]  ;;  %v49_v15 = vld [vmem:[#allocation5] sm:$0xff]  ;;  %v47_v16 = vld [vmem:[#allocation2] sm:$0xff] }
  0x12   :  { %v48_v17 = vld [vmem:[#allocation2 + $0x8] sm:$0xff]  ;;  %v135_v18 = vld [vmem:[%s262_s2] ss:$0 sm:$0xff] }
  0x13   :  { %72 = vmatpush.msra.mxu0 %v61_v3  ;;  %117 = vmatpush.msra.mxu1 %v61_v3 }
  0x15   :  { %73 = vmatpush.msra.mxu0 %v60_v4  ;;  %118 = vmatpush.msra.mxu1 %v60_v4 }
  0x17   :  { %74 = vmatpush.msra.mxu0 %v59_v5  ;;  %119 = vmatpush.msra.mxu1 %v59_v5 }
  0x19   :  { %75 = vmatpush.msra.mxu0 %v58_v6  ;;  %120 = vmatpush.msra.mxu1 %v58_v6 }
  0x1b   :  { %76 = vmatpush.msra.mxu0 %v57_v7  ;;  %121 = vmatpush.msra.mxu1 %v57_v7 }
  0x1d   :  { %77 = vmatpush.msra.mxu0 %v56_v8  ;;  %122 = vmatpush.msra.mxu1 %v56_v8 }
  0x1f   :  { %78 = vmatpush.msra.mxu0 %v55_v9  ;;  %123 = vmatpush.msra.mxu1 %v55_v9 }
  0x21   :  { %79 = vmatpush.msra.mxu0 %v54_v10  ;;  %124 = vmatpush.msra.mxu1 %v54_v10 }
  0x23   :  { %80 = vmatpush.msra.mxu0 %v53_v11  ;;  %125 = vmatpush.msra.mxu1 %v53_v11 }
  0x25   :  { %81 = vmatpush.msra.mxu0 %v52_v12  ;;  %126 = vmatpush.msra.mxu1 %v52_v12 }
  0x27   :  { %82 = vmatpush.msra.mxu0 %v51_v13  ;;  %127 = vmatpush.msra.mxu1 %v51_v13 }
  0x29   :  { %83 = vmatpush.msra.mxu0 %v50_v14  ;;  %128 = vmatpush.msra.mxu1 %v50_v14 }
  0x2b   :  { %84 = vmatpush.msra.mxu0 %v49_v15  ;;  %129 = vmatpush.msra.mxu1 %v49_v15 }
  0x2c   :  { %85 = vmatmul.f32.vlgmr.msra.gmra.mxu0 %v47_v16  ;;  %88 = vmatmul.f32.vlgmr.msra.gmra.mxu1 %v48_v17 }
  0xa9   :  { %v86_v19 = vpop.f32.mrf.mxu0  ;;  %v89_v20 = vpop.f32.mrf.mxu1 }
  0xaa   :  { %v87_v21 = vadd.f32 %v135_v18, %v86_v19  ;;  %v90_v22 = vadd.f32 %v135_v18, %v89_v20 }
  0xac   :  { %92 = vst [vmem:[#allocation7] sm:$0xff] %v87_v21 }
  0xad   :  { %93 = vst [vmem:[#allocation7 + $0x8] sm:$0xff] %v90_v22 }
  0xae   :  { %106 = dma.vmem_to_hbm [thread:$0]  %s99_s25, 256, %s101_s28, [#allocation4], %s215_s20, %s215_s20, %s216_s21  }
  0xaf   :  { %212 = dma.done.wait [#allocation4], 256  }
  0xb0   :  { %213 = vsyncadd [#allocation4], 4294967040 }
  0xb1   :  { %111 = vsyncpa [#allocation3], 1 }
  0xb2   :  { %112 = vsyncpa [#allocation6], 1 }
  0xb3   :  { %113 = vsyncpa [#allocation4], 1 }

</bundles_post_ra>
